<compile_context>
chip_gen: v6e
topology: v6e:2x2x1
jax: 0.10.0
libtpu: 0.0.40
codegen_flags: <defaults>
</compile_context>

<pallas_src>
import functools

import jax
import jax.numpy as jnp
import numpy as np
from jax import lax
from jax.experimental import pallas as pl
from jax.experimental.pallas import tpu as pltpu


# --------------------------------------------------------------------------- #
# Pass 1: GCN embeddings  E = A_norm @ relu(A_norm @ (X W1) + b1) W2 + b2
# (single invocation; resident set is A, X, weights and the small (N, EMB)
#  embedding -- no N^2 temporaries besides A itself).
# --------------------------------------------------------------------------- #
def _embedding_kernel(x_ref, a_ref, w1_ref, b1_ref, w2_ref, b2_ref, emb_ref,
                      *, matmul_dtype):
    a_f32 = a_ref[...].astype(jnp.float32)
    # deg includes the self loop: deg_i = sum_j A_ij + 1  (always >= 1 -> rsqrt safe)
    deg = jnp.sum(a_f32, axis=1, keepdims=True) + 1.0          # (N, 1)
    d = lax.rsqrt(deg)                                          # (N, 1) f32

    a_mx = a_f32.astype(matmul_dtype)

    def propagate(y):
        # A_norm @ y == d * (A @ (d*y) + (d*y)),  A_norm = D^-1/2 (A + I) D^-1/2
        ys = d * y                                              # row-scale (f32)
        t = jnp.dot(a_mx, ys.astype(matmul_dtype),
                    preferred_element_type=jnp.float32) + ys    # A@ys + self loop
        return d * t

    x = x_ref[...].astype(matmul_dtype)
    s1 = jnp.dot(x, w1_ref[...].astype(matmul_dtype),
                 preferred_element_type=jnp.float32)            # (N, HID)
    h = jnp.maximum(propagate(s1) + b1_ref[...], 0.0)           # ReLU
    s2 = jnp.dot(h.astype(matmul_dtype), w2_ref[...].astype(matmul_dtype),
                 preferred_element_type=jnp.float32)            # (N, EMB)
    emb_ref[...] = propagate(s2) + b2_ref[...]


# --------------------------------------------------------------------------- #
# Pass 2: tiled, lane-dense similarity -> edge probabilities
#   P[i_blk, j_blk] = sigmoid(f * E[i_blk] @ E[j_blk]^T + b)
# --------------------------------------------------------------------------- #
def _similarity_kernel(scal_ref, emb_i_ref, emb_j_ref, out_ref, *, matmul_dtype):
    ei = emb_i_ref[...].astype(matmul_dtype)
    ej = emb_j_ref[...].astype(matmul_dtype)
    # Contract dim 1 of both operands: no explicit transposed copy of E.
    sim = lax.dot_general(ei, ej,
                          dimension_numbers=(((1,), (1,)), ((), ())),
                          preferred_element_type=jnp.float32)
    probs_factor = scal_ref[0]
    probs_bias = scal_ref[1]
    # sigmoid already lands in [0, 1]; the reference clamp(., 0, 1) is a no-op.
    out_ref[...] = jax.nn.sigmoid(probs_factor * sim + probs_bias)


def _pick_tile(n):
    # Largest lane-friendly tile that evenly divides n; fall back to the full
    # extent (allowed when block_shape == array dim) for small / ragged graphs.
    for t in (512, 256, 128):
        if n % t == 0:
            return t
    return n


def graph_proposal_forward(features, adj, w1, b1, w2, b2,
                           probs_factor, probs_bias, *,
                           matmul_dtype=jnp.float32):
    n, _ = features.shape
    emb_dim = w2.shape[1]

    vmem = pl.BlockSpec(memory_space=pltpu.MemorySpace.VMEM)
    smem = pl.BlockSpec(memory_space=pltpu.MemorySpace.SMEM)

    # 48 MiB scoped VMEM: above the 16/32 MiB defaults, below v7x's 64 MiB physical.
    vmem_budget = 48 * 1024 * 1024

    # ---- pass 1: embeddings -------------------------------------------------
    emb = pl.pallas_call(
        functools.partial(_embedding_kernel, matmul_dtype=matmul_dtype),
        out_shape=jax.ShapeDtypeStruct((n, emb_dim), jnp.float32),
        in_specs=[vmem, vmem, vmem, vmem, vmem, vmem],
        out_specs=vmem,
        compiler_params=pltpu.CompilerParams(vmem_limit_bytes=vmem_budget),
    )(features, adj, w1, b1, w2, b2)

    # ---- pass 2: similarity / probabilities, tiled over a parallel 2-D grid --
    scalars = jnp.asarray([probs_factor, probs_bias], dtype=jnp.float32)
    tm = _pick_tile(n)
    tn = _pick_tile(n)
    grid = (n // tm, n // tn)

    probs = pl.pallas_call(
        functools.partial(_similarity_kernel, matmul_dtype=matmul_dtype),
        out_shape=jax.ShapeDtypeStruct((n, n), jnp.float32),
        grid=grid,
        in_specs=[smem,
                  pl.BlockSpec((tm, emb_dim), lambda i, j: (i, 0)),
                  pl.BlockSpec((tn, emb_dim), lambda i, j: (j, 0))],
        out_specs=pl.BlockSpec((tm, tn), lambda i, j: (i, j)),
        compiler_params=pltpu.CompilerParams(
            dimension_semantics=("parallel", "parallel"),
            vmem_limit_bytes=vmem_budget),
    )(scalars, emb, emb)
    return probs


def _reference(features, adj, w1, b1, w2, b2, probs_factor, probs_bias):
    n = features.shape[0]
    a_hat = adj + jnp.eye(n, dtype=jnp.float32)
    d_inv_sqrt = 1.0 / jnp.sqrt(jnp.sum(a_hat, axis=1, keepdims=True))
    a_norm = a_hat * d_inv_sqrt * d_inv_sqrt.T
    h = jnp.maximum(a_norm @ (features @ w1) + b1, 0.0)
    emb = a_norm @ (h @ w2) + b2
    sim = emb @ emb.T
    return jnp.clip(jax.nn.sigmoid(probs_factor * sim + probs_bias), 0.0, 1.0)


if __name__ == "__main__":
    # Small, module-consistent shapes: N nodes, F input features,
    # embedding_dim = 32 -> hidden = 64, out = 32.
    N, F = 16, 8
    EMB = 32
    HID = 2 * EMB

    key = jax.random.PRNGKey(0)
    k_x, k_a, k_w1, k_w2 = jax.random.split(key, 4)

    # Deterministic inputs: node features + symmetric 0/1 adjacency, no self loops.
    features = jax.random.normal(k_x, (N, F), dtype=jnp.float32)
    a_rand = jax.random.uniform(k_a, (N, N), dtype=jnp.float32)
    a_sym = (a_rand + a_rand.T) * 0.5
    adj = (a_sym > 0.5).astype(jnp.float32)
    adj = adj * (1.0 - jnp.eye(N, dtype=jnp.float32))

    # Deterministic GCN parameters (Glorot-ish scaling), zero biases.
    w1 = jax.random.normal(k_w1, (F, HID), dtype=jnp.float32) * (1.0 / np.sqrt(F))
    b1 = jnp.zeros((1, HID), dtype=jnp.float32)
    w2 = jax.random.normal(k_w2, (HID, EMB), dtype=jnp.float32) * (1.0 / np.sqrt(HID))
    b2 = jnp.zeros((1, EMB), dtype=jnp.float32)

    probs_factor = 1.0   # probs_factor_init
    probs_bias = 0.0     # probs_bias_init

    # f32 MXU operands here so the tight f32 reference tolerance holds at demo
    # scale; pass matmul_dtype=jnp.bfloat16 for large graphs (f32 accumulation,
    # ~1e-2 rtol expected on the NxN contractions).
    out = graph_proposal_forward(features, adj, w1, b1, w2, b2,
                                 probs_factor, probs_bias,
                                 matmul_dtype=jnp.float32)
    out = jax.block_until_ready(out)

    ref = _reference(features, adj, w1, b1, w2, b2, probs_factor, probs_bias)
    assert out.shape == (N, N)
    assert np.allclose(np.asarray(out), np.asarray(ref), atol=1e-5, rtol=1e-5)

    # TODO(synk): Sampler.sample / refine() caching are stateful host-side logic,
    # not part of the forward hot path, so they are not implemented in-kernel.
    print("KERNEL_OK")
</pallas_src>

<mosaic_0001>
module attributes {stable_mosaic.version = 11 : i64} {
  func.func @_embedding_kernel(%arg0: memref<16x8xf32, #tpu.memory_space<vmem>>, %arg1: memref<16x16xf32, #tpu.memory_space<vmem>>, %arg2: memref<8x64xf32, #tpu.memory_space<vmem>>, %arg3: memref<1x64xf32, #tpu.memory_space<vmem>>, %arg4: memref<64x32xf32, #tpu.memory_space<vmem>>, %arg5: memref<1x32xf32, #tpu.memory_space<vmem>>, %arg6: memref<16x32xf32, #tpu.memory_space<vmem>>) attributes {dimension_semantics = [], scalar_prefetch = 0 : i64, scratch_operands = 0 : i64, tpu.core_type = #tpu.core_type<tc>} {
    %c0 = arith.constant 0 : index
    %c0_0 = arith.constant 0 : index
    %0 = vector.load %arg1[%c0, %c0_0] : memref<16x16xf32, #tpu.memory_space<vmem>>, vector<16x16xf32>
    %cst = arith.constant dense<0.000000e+00> : vector<16xf32>
    %1 = vector.multi_reduction <add>, %0, %cst [1] : vector<16x16xf32> to vector<16xf32>
    %2 = vector.shape_cast %1 : vector<16xf32> to vector<16x1xf32>
    %cst_1 = arith.constant 1.000000e+00 : f32
    %3 = vector.broadcast %cst_1 : f32 to vector<16x1xf32>
    %4 = arith.addf %2, %3 : vector<16x1xf32>
    %5 = math.rsqrt %4 : vector<16x1xf32>
    %c0_2 = arith.constant 0 : index
    %c0_3 = arith.constant 0 : index
    %6 = vector.load %arg0[%c0_2, %c0_3] : memref<16x8xf32, #tpu.memory_space<vmem>>, vector<16x8xf32>
    %c0_4 = arith.constant 0 : index
    %c0_5 = arith.constant 0 : index
    %7 = vector.load %arg2[%c0_4, %c0_5] : memref<8x64xf32, #tpu.memory_space<vmem>>, vector<8x64xf32>
    %cst_6 = arith.constant dense<0.000000e+00> : vector<16x64xf32>
    %8 = tpu.matmul %6, %7, %cst_6 {dimension_numbers = #tpu.dot_dimension_numbers<[1], [0], [0], [1], [0, 0, 1, 1], [], []>} : vector<16x8xf32>, vector<8x64xf32>, vector<16x64xf32> -> vector<16x64xf32>
    %9 = vector.broadcast %5 : vector<16x1xf32> to vector<16x64xf32>
    %10 = arith.mulf %9, %8 : vector<16x64xf32>
    %cst_7 = arith.constant dense<0.000000e+00> : vector<16x64xf32>
    %11 = tpu.matmul %0, %10, %cst_7 {dimension_numbers = #tpu.dot_dimension_numbers<[1], [0], [0], [1], [0, 0, 1, 1], [], []>} : vector<16x16xf32>, vector<16x64xf32>, vector<16x64xf32> -> vector<16x64xf32>
    %12 = arith.addf %11, %10 : vector<16x64xf32>
    %13 = vector.broadcast %5 : vector<16x1xf32> to vector<16x64xf32>
    %14 = arith.mulf %13, %12 : vector<16x64xf32>
    %c0_8 = arith.constant 0 : index
    %c0_9 = arith.constant 0 : index
    %15 = vector.load %arg3[%c0_8, %c0_9] : memref<1x64xf32, #tpu.memory_space<vmem>>, vector<1x64xf32>
    %16 = vector.broadcast %15 : vector<1x64xf32> to vector<16x64xf32>
    %17 = arith.addf %14, %16 : vector<16x64xf32>
    %cst_10 = arith.constant 0.000000e+00 : f32
    %18 = vector.broadcast %cst_10 : f32 to vector<16x64xf32>
    %19 = arith.maximumf %17, %18 : vector<16x64xf32>
    %c0_11 = arith.constant 0 : index
    %c0_12 = arith.constant 0 : index
    %20 = vector.load %arg4[%c0_11, %c0_12] : memref<64x32xf32, #tpu.memory_space<vmem>>, vector<64x32xf32>
    %cst_13 = arith.constant dense<0.000000e+00> : vector<16x32xf32>
    %21 = tpu.matmul %19, %20, %cst_13 {dimension_numbers = #tpu.dot_dimension_numbers<[1], [0], [0], [1], [0, 0, 1, 1], [], []>} : vector<16x64xf32>, vector<64x32xf32>, vector<16x32xf32> -> vector<16x32xf32>
    %22 = vector.broadcast %5 : vector<16x1xf32> to vector<16x32xf32>
    %23 = arith.mulf %22, %21 : vector<16x32xf32>
    %cst_14 = arith.constant dense<0.000000e+00> : vector<16x32xf32>
    %24 = tpu.matmul %0, %23, %cst_14 {dimension_numbers = #tpu.dot_dimension_numbers<[1], [0], [0], [1], [0, 0, 1, 1], [], []>} : vector<16x16xf32>, vector<16x32xf32>, vector<16x32xf32> -> vector<16x32xf32>
    %25 = arith.addf %24, %23 : vector<16x32xf32>
    %26 = vector.broadcast %5 : vector<16x1xf32> to vector<16x32xf32>
    %27 = arith.mulf %26, %25 : vector<16x32xf32>
    %c0_15 = arith.constant 0 : index
    %c0_16 = arith.constant 0 : index
    %28 = vector.load %arg5[%c0_15, %c0_16] : memref<1x32xf32, #tpu.memory_space<vmem>>, vector<1x32xf32>
    %29 = vector.broadcast %28 : vector<1x32xf32> to vector<16x32xf32>
    %30 = arith.addf %27, %29 : vector<16x32xf32>
    %c0_17 = arith.constant 0 : index
    %c0_18 = arith.constant 0 : index
    %31 = vector.load %arg6[%c0_17, %c0_18] : memref<16x32xf32, #tpu.memory_space<vmem>>, vector<16x32xf32>
    tpu.vector_store %arg6[%c0_17, %c0_18], %30 {strides = array<i32>} : memref<16x32xf32, #tpu.memory_space<vmem>>, vector<16x32xf32>,
    return
  }
}

</mosaic_0001>

<bundles_post_ra>
// kernel: tpu_custom_call.1
= control target key start
LH: loop header
LB: loop body
LE: loop exit
PB: predicated region body
PF: predicated region fallthrough
CT: control target
= control target key end

     0   :  { %vm40_vm0 = vcmask 64512   ;;  %vm26_vm1 = vcmask 130048   ;;  %s610_s0 = inlined_call_operand.vmem [shape: f32[16,8], index: 0, kind: input, shape index: {}]   ;;  %s611_s1 = inlined_call_operand.vmem [shape: f32[16,16], index: 1, kind: input, shape index: {}]   ;;  %s612_s2 = inlined_call_operand.vmem [shape: f32[8,64], index: 2, kind: input, shape index: {}]   ;;  %s613_s3 = inlined_call_operand.vmem [shape: f32[1,64], index: 3, kind: input, shape index: {}]   ;;  %s614_s4 = inlined_call_operand.vmem [shape: f32[64,32], index: 4, kind: input, shape index: {}]   ;;  %s615_s5 = inlined_call_operand.vmem [shape: f32[1,32], index: 5, kind: input, shape index: {}]   ;;  %s616_s6 = inlined_call_operand.hbm [shape: f32[16,32], index: 6, kind: output, shape index: {}]  }
   0x1   :  { %v39_v0 = vld [vmem:[%s612_s2] sm:$0xff]  ;;  %v38_v2 = vld [vmem:[%s610_s0 + $0x8] sm:$0xff] }
   0x2   :  { %v37_v1 = vld [vmem:[%s610_s0] sm:$0xff]  ;;  %446 = vmatprep.subr.mxu1 %v39_v0  ;;  %v563_v3 = vld [vmem:[%s611_s1 + $0x8] sm:$0xff] }
   0x3   :  { %448 = vmatprep.mubr.msk.f32.mxu1 %vm40_vm0, %v37_v1  ;;  %v24_v4 = vld [vmem:[%s611_s1] sm:$0xff] }
   0x4   :  { %11 = vsyncpa [#allocation3], 0  ;;  %447 = vmatpush3.msra.mxu1 %v39_v0  ;;  %v30_v5 = vsel %vm26_vm1, %v563_v3, 0.0  ;;  %v27_v6 = vsel %vm26_vm1, %v24_v4, 0.0  ;;  %v225_v7 = vld [vmem:[%s614_s4 + $0x38] sm:$0xff]  ;;  %v224_v8 = vld [vmem:[%s614_s4 + $0x30] sm:$0xff] }
   0x5   :  { %449 = vmatmul.mubr.msk.f32.vlgmr.msra.gmra.mxu1 %vm40_vm0, %v38_v2  ;;  %31 = vadd.xlane.f32.xlu0 %v30_v5  ;;  %v223_v19 = vld [vmem:[%s614_s4 + $0x28] sm:$0xff]  ;;  %v222_v20 = vld [vmem:[%s614_s4 + $0x20] sm:$0xff]  ;;  %v221_v21 = vld [vmem:[%s614_s4 + $0x18] sm:$0xff]  ;;  %vm226_vm2 = vcmask 523264   ;;  %s513_s22 = smov [#allocation2]   ;;  %vm396_vm3 = vcmask 261120  }
   0x6   :  { %455 = vmatprep.mubr.msk.f32.mxu1 %vm26_vm1, %v24_v4  ;;  %458 = vmatprep.subr.mxu0 %v225_v7  ;;  %v220_v22 = vld [vmem:[%s614_s4 + $0x10] sm:$0xff]  ;;  %v219_v23 = vld [vmem:[%s614_s4 + $0x8] sm:$0xff]  ;;  %v218_v24 = vld [vmem:[%s614_s4] sm:$0xff]  ;;  %s404_s23 = sshll.u32 %s513_s22, 4  ;;  %s405_s23 = int_to_ptr.vmem [resolvable:$true] %s404_s23 }
   0x7   :  { %459 = vmatpush3.msra.mxu0 %v225_v7  ;;  %v419_v30 = vld [vmem:[%s613_s3] ss:$0 sm:$0xff]  ;;  %s491_s24 = scalar_lea.vmem %s405_s23, 256  ;;  %p496_p1 = scmp.lt.s32.totalorder %s405_s23, %s405_s23 }
   0x8   :  { %460 = vmatprep.subr.mxu0 %v224_v8  ;;  %v424_v42 = vld [vmem:[%s615_s5] ss:$0 sm:$0xff]  ;;  %p492_p0 = scmp.ne.s32.totalorder %s405_s23, %s491_s24  ;;  %p497_p2 = scmp.lt.s32.totalorder %s491_s24, %s491_s24 }
   0x9   :  { %28 = vadd.xlane.f32.xlu0 %v27_v6  ;;  %461 = vmatpush3.msra.mxu0 %v224_v8 }
   0xa   :  { %462 = vmatprep.subr.mxu0 %v223_v19  ;;  %p498_p3 = por %p497_p2, %p496_p1 }
   0xb   :  { %463 = vmatpush3.msra.mxu0 %v223_v19 }
   0xc   :  { %464 = vmatprep.subr.mxu0 %v222_v20  ;;  %p499_p4 = pnand %p498_p3, %p492_p0 }
   0xd   :  { %465 = vmatpush3.msra.mxu0 %v222_v20 }
   0xe   :  { %466 = vmatprep.subr.mxu0 %v221_v21 }
   0xf   :  { %467 = vmatpush3.msra.mxu0 %v221_v21 }
  0x10   :  { %468 = vmatprep.subr.mxu0 %v220_v22 }
  0x11   :  { %469 = vmatpush3.msra.mxu0 %v220_v22 }
  0x12   :  { %470 = vmatprep.subr.mxu0 %v219_v23 }
  0x13   :  { %471 = vmatpush3.msra.mxu0 %v219_v23 }
  0x14   :  { %472 = vmatprep.subr.mxu0 %v218_v24 }
  0x15   :  { %473 = vmatpush3.msra.mxu0 %v218_v24 }
  0x8e   :  { %v32_v9 = vpop.xlane.xlu0 %31 }
  0x8f   :  { %v34_v11 = vadd.f32 1.0, %v32_v9 }
  0x91   :  { %487 = vrsqrt.f32 %v34_v11 }
  0x92   :  { %v29_v10 = vpop.xlane.xlu0 %28 }
  0x93   :  { %v33_v12 = vadd.f32 1.0, %v29_v10 }
  0x95   :  { %489 = vrsqrt.f32 %v33_v12 }
  0x9e   :  { %v488_v13 = vpop.eup %487 }
  0xa2   :  { %v490_v14 = vpop.eup %489 }
  0xc5   :  { %v450_v15 = vpop.f32.mrf.mxu1 }
  0xc6   :  { %v123_v16 = vmul.f32 %v488_v13, %v450_v15 }
  0xc7   :  { %v113_v17 = vpop.f32.mrf.mxu1 }
  0xc8   :  { %v122_v18 = vmul.f32 %v490_v14, %v113_v17  ;;  %451 = vmatprep.subr.mxu1 %v123_v16 }
  0xc9   :  { %452 = vmatpush3.msra.mxu1 %v123_v16 }
  0xca   :  { %453 = vmatprep.subr.mxu1 %v122_v18 }
  0xcb   :  { %454 = vmatpush3.msra.mxu1 %v122_v18 }
  0xcc   :  { %456 = vmatmul.mubr.msk.f32.vlgmr.msra.gmra.mxu1 %vm26_vm1, %v563_v3 }
  0xcd   :  { %481 = vmatprep.mubr.msk.f32.mxu1 %vm26_vm1, %v24_v4 }
 0x18c   :  { %v457_v25 = vpop.f32.mrf.mxu1 }
 0x18d   :  { %v202_v26 = vadd.f32 %v457_v25, %v123_v16 }
 0x18e   :  { %v196_v27 = vpop.f32.mrf.mxu1 }
 0x18f   :  { %v206_v28 = vmul.f32 %v488_v13, %v202_v26  ;;  %v197_v29 = vadd.f32 %v196_v27, %v122_v18 }
 0x191   :  { %v205_v31 = vmul.f32 %v490_v14, %v197_v29  ;;  %v215_v32 = vadd.f32 %v419_v30, %v206_v28 }
 0x193   :  { %v214_v33 = vadd.f32 %v419_v30, %v205_v31  ;;  %v217_v35 = vmax.f32 %v215_v32, 0.0 }
 0x195   :  { %v216_v34 = vmax.f32 %v214_v33, 0.0 }
 0x197   :  { %474 = vmatprep.mubr.msk.f32.mxu0 %vm226_vm2, %v216_v34 }
 0x198   :  { %475 = vmatmul.mubr.msk.f32.vlgmr.msra.gmra.mxu0 %vm226_vm2, %v217_v35 }
 0x258   :  { %v476_v36 = vpop.f32.mrf.mxu0 }
 0x259   :  { %v309_v37 = vmul.f32 %v488_v13, %v476_v36 }
 0x25a   :  { %v299_v38 = vpop.f32.mrf.mxu0 }
 0x25b   :  { %v308_v39 = vmul.f32 %v490_v14, %v299_v38  ;;  %477 = vmatprep.subr.mxu1 %v309_v37 }
 0x25c   :  { %478 = vmatpush3.msra.mxu1 %v309_v37 }
 0x25d   :  { %479 = vmatprep.subr.mxu1 %v308_v39 }
 0x25e   :  { %480 = vmatpush3.msra.mxu1 %v308_v39 }
 0x25f   :  { %482 = vmatmul.mubr.msk.f32.vlgmr.msra.gmra.mxu1 %vm26_vm1, %v563_v3 }
 0x31f   :  { %v483_v40 = vpop.f32.mrf.mxu1 }
 0x320   :  { %v382_v41 = vadd.f32 %v483_v40, %v309_v37 }
 0x321   :  { %v376_v43 = vpop.f32.mrf.mxu1 }
 0x322   :  { %v386_v44 = vmul.f32 %v488_v13, %v382_v41  ;;  %v377_v45 = vadd.f32 %v376_v43, %v308_v39 }
 0x324   :  { %v395_v46 = vadd.f32 %v424_v42, %v386_v44  ;;  %v385_v47 = vmul.f32 %v490_v14, %v377_v45 }
 0x326   :  { %398 = vst.msk [vmem:[#allocation2 + $0x8] sm:$0xff] %vm396_vm3, %v395_v46  ;;  %v394_v48 = vadd.f32 %v424_v42, %v385_v47 }
 0x328   :  { %397 = vst.msk [vmem:[#allocation2] sm:$0xff] %vm396_vm3, %v394_v48 }
 0x329   :  { %502 = shalt.err (!%p499_p4)
}
 0x32a   :  { %s514_s5 = smov 128   ;;  %s515_s25 = smov 8  }
 0x32b   :  { %410 = dma.vmem_to_hbm [thread:$0]  %s405_s23, 256, %s616_s6, [#allocation3], %s514_s5, %s514_s5, %s515_s25  }
 0x32c   :  { %511 = dma.done.wait [#allocation3], 256  }
 0x32d   :  { %512 = vsyncadd [#allocation3], 4294967040 }
 0x32e   :  { %414 = vsyncpa [#allocation3], 1 }

</bundles_post_ra>
